<compile_context>
chip_gen: v7x
topology: tpu7x:2x2x1
jax: 0.10.0
libtpu: 0.0.40
codegen_flags: <defaults>
</compile_context>

<pallas_src>
import jax
import jax.numpy as jnp
from jax import lax
from jax.experimental import pallas as pl
from jax.experimental.pallas import tpu as pltpu

# Model hyper-parameters (synthetic, small versions of the real 1774/NUM_SUBJECTS).
NUM_QUESTIONS = 128
NUM_SUBJECTS = 32
K = 32
BATCH = 256          # many rows per pallas_call -> overhead amortized
TILE_B = 128         # rows per grid step
D_IN = NUM_QUESTIONS + NUM_SUBJECTS


def _sigmoid_f32(z):
    """sigmoid in f32: exp on the EUP, divide via approx EUP reciprocal."""
    return pl.reciprocal(1.0 + jnp.exp(-z), approx=True)


def autoencoder_kernel(x_ref, wg_ref, bg_ref, wh_ref, bh_ref, out_ref):
    """One batch tile of the forward pass.

    x_ref  : (TILE_B, D_IN)  f32
    wg_ref : (K, D_IN)       bf16   torch layout (out_features, in_features)
    bg_ref : (1, K)          f32
    wh_ref : (Q, K)          bf16   torch layout
    bh_ref : (1, Q)          f32
    out_ref: (TILE_B, Q)     f32
    """
    x = x_ref[...].astype(jnp.bfloat16)

    # Layer g: contract x's feature axis with wg's in_features axis (no transpose).
    z1 = lax.dot_general(
        x, wg_ref[...],
        dimension_numbers=(((1,), (1,)), ((), ())),
        preferred_element_type=jnp.float32,
    ) + bg_ref[...]
    a1 = _sigmoid_f32(z1)

    # Layer h.
    z2 = lax.dot_general(
        a1.astype(jnp.bfloat16), wh_ref[...],
        dimension_numbers=(((1,), (1,)), ((), ())),
        preferred_element_type=jnp.float32,
    ) + bh_ref[...]
    out_ref[...] = _sigmoid_f32(z2)


def autoencoder_forward(x, wg_bf16, bg, wh_bf16, bh, *, tile_b=TILE_B):
    """Forward pass.

    x       : (B, D_IN)  f32
    wg_bf16 : (K, D_IN)  bf16  (g.weight, torch layout, stored bf16 once)
    bg      : (K,)       f32
    wh_bf16 : (Q, K)     bf16  (h.weight, torch layout, stored bf16 once)
    bh      : (Q,)       f32
    returns : (B, Q)     f32
    """
    B, d_in = x.shape
    k = wg_bf16.shape[0]
    q = wh_bf16.shape[0]

    # Pad batch to a multiple of the tile (no-op when already divisible).
    n_tiles = pl.cdiv(B, tile_b)
    b_pad = n_tiles * tile_b
    if b_pad != B:
        x = jnp.pad(x, ((0, b_pad - B), (0, 0)))

    bg2 = bg.reshape(1, k)
    bh2 = bh.reshape(1, q)

    out = pl.pallas_call(
        autoencoder_kernel,
        out_shape=jax.ShapeDtypeStruct((b_pad, q), jnp.float32),
        grid=(n_tiles,),
        in_specs=[
            pl.BlockSpec((tile_b, d_in), lambda i: (i, 0)),   # x: new tile per step
            pl.BlockSpec((k, d_in), lambda i: (0, 0)),        # g.weight: resident
            pl.BlockSpec((1, k), lambda i: (0, 0)),           # g.bias:   resident
            pl.BlockSpec((q, k), lambda i: (0, 0)),           # h.weight: resident
            pl.BlockSpec((1, q), lambda i: (0, 0)),           # h.bias:   resident
        ],
        out_specs=pl.BlockSpec((tile_b, q), lambda i: (i, 0)),
        compiler_params=pltpu.CompilerParams(
            dimension_semantics=("parallel",),                # megacore split on v7x
        ),
    )(x, wg_bf16, bg2, wh_bf16, bh2)

    return out[:B]


def _reference(x, wg, bg, wh, bh):
    """Pure-JAX f32 reference matching the PyTorch forward."""
    a1 = jax.nn.sigmoid(x @ wg.T + bg)
    return jax.nn.sigmoid(a1 @ wh.T + bh)


if __name__ == "__main__":
    key = jax.random.PRNGKey(0)
    k_x, k_wg, k_bg, k_wh, k_bh = jax.random.split(key, 5)

    # Deterministic synthetic parameters (same shapes nn.Linear would create).
    x = jax.random.normal(k_x, (BATCH, D_IN), dtype=jnp.float32)
    wg = jax.random.normal(k_wg, (K, D_IN), dtype=jnp.float32) * 0.05            # g.weight
    bg = jax.random.normal(k_bg, (K,), dtype=jnp.float32) * 0.05                 # g.bias
    wh = jax.random.normal(k_wh, (NUM_QUESTIONS, K), dtype=jnp.float32) * 0.05   # h.weight
    bh = jax.random.normal(k_bh, (NUM_QUESTIONS,), dtype=jnp.float32) * 0.05     # h.bias

    # Parameters are stored once in bf16 (outside the forward path): no per-call
    # transpose, half the weight DMA traffic.
    wg_p = wg.astype(jnp.bfloat16)
    wh_p = wh.astype(jnp.bfloat16)

    out = autoencoder_forward(x, wg_p, bg, wh_p, bh)
    out = jax.block_until_ready(out)

    ref = _reference(x, wg, bg, wh, bh)
    assert out.shape == (BATCH, NUM_QUESTIONS)
    # bf16 matmul inputs + approx reciprocal -> compare against f32 reference
    # with a correspondingly looser tolerance.
    assert jnp.allclose(out, ref, atol=1e-2, rtol=1e-2), "mismatch vs reference"

    # TODO(synk): get_weight_norm() is a training-time helper, not part of the
    # forward pass; it is intentionally not implemented as a kernel.

    print("KERNEL_OK")
</pallas_src>

<mosaic_0001>
module attributes {stable_mosaic.version = 11 : i64} {
  func.func @autoencoder_kernel(%arg0: i32, %arg1: memref<128x160xf32, #tpu.memory_space<vmem>>, %arg2: memref<32x160xbf16, #tpu.memory_space<vmem>>, %arg3: memref<1x32xf32, #tpu.memory_space<vmem>>, %arg4: memref<128x32xbf16, #tpu.memory_space<vmem>>, %arg5: memref<1x128xf32, #tpu.memory_space<vmem>>, %arg6: memref<128x128xf32, #tpu.memory_space<vmem>>) attributes {dimension_semantics = [#tpu.dimension_semantics<parallel>], iteration_bounds = array<i64: 2>, scalar_prefetch = 0 : i64, scratch_operands = 0 : i64, tpu.core_type = #tpu.core_type<tc>, window_params = [{transform_indices = @transform_0, window_bounds = array<i64: 128, 160>}, {pipeline_mode = #tpu.pipeline_mode<synchronous>, transform_indices = @transform_1, window_bounds = array<i64: 32, 160>}, {pipeline_mode = #tpu.pipeline_mode<synchronous>, transform_indices = @transform_2, window_bounds = array<i64: 1, 32>}, {pipeline_mode = #tpu.pipeline_mode<synchronous>, transform_indices = @transform_3, window_bounds = array<i64: 128, 32>}, {pipeline_mode = #tpu.pipeline_mode<synchronous>, transform_indices = @transform_4, window_bounds = array<i64: 1, 128>}, {transform_indices = @transform_5, window_bounds = array<i64: 128, 128>}]} {
    %c0 = arith.constant 0 : index
    %c0_0 = arith.constant 0 : index
    %0 = vector.load %arg1[%c0, %c0_0] : memref<128x160xf32, #tpu.memory_space<vmem>>, vector<128x160xf32>
    %1 = arith.truncf %0 : vector<128x160xf32> to vector<128x160xbf16>
    %c0_1 = arith.constant 0 : index
    %c0_2 = arith.constant 0 : index
    %2 = vector.load %arg2[%c0_1, %c0_2] : memref<32x160xbf16, #tpu.memory_space<vmem>>, vector<32x160xbf16>
    %cst = arith.constant dense<0.000000e+00> : vector<128x32xf32>
    %3 = tpu.matmul %1, %2, %cst {dimension_numbers = #tpu.dot_dimension_numbers<[1], [1], [0], [0], [0, 0, 1, 0], [], []>} : vector<128x160xbf16>, vector<32x160xbf16>, vector<128x32xf32> -> vector<128x32xf32>
    %c0_3 = arith.constant 0 : index
    %c0_4 = arith.constant 0 : index
    %4 = vector.load %arg3[%c0_3, %c0_4] : memref<1x32xf32, #tpu.memory_space<vmem>>, vector<1x32xf32>
    %5 = vector.broadcast %4 : vector<1x32xf32> to vector<128x32xf32>
    %6 = arith.addf %3, %5 : vector<128x32xf32>
    %cst_5 = arith.constant 0.000000e+00 : f32
    %7 = vector.broadcast %cst_5 : f32 to vector<128x32xf32>
    %8 = arith.subf %7, %6 : vector<128x32xf32>
    %9 = math.exp %8 : vector<128x32xf32>
    %cst_6 = arith.constant 1.000000e+00 : f32
    %10 = vector.broadcast %cst_6 : f32 to vector<128x32xf32>
    %11 = arith.addf %10, %9 : vector<128x32xf32>
    %12 = tpu.reciprocal %11 {approx = true} : vector<128x32xf32> -> vector<128x32xf32>
    %13 = arith.truncf %12 : vector<128x32xf32> to vector<128x32xbf16>
    %c0_7 = arith.constant 0 : index
    %c0_8 = arith.constant 0 : index
    %14 = vector.load %arg4[%c0_7, %c0_8] : memref<128x32xbf16, #tpu.memory_space<vmem>>, vector<128x32xbf16>
    %cst_9 = arith.constant dense<0.000000e+00> : vector<128x128xf32>
    %15 = tpu.matmul %13, %14, %cst_9 {dimension_numbers = #tpu.dot_dimension_numbers<[1], [1], [0], [0], [0, 0, 1, 0], [], []>} : vector<128x32xbf16>, vector<128x32xbf16>, vector<128x128xf32> -> vector<128x128xf32>
    %c0_10 = arith.constant 0 : index
    %c0_11 = arith.constant 0 : index
    %16 = vector.load %arg5[%c0_10, %c0_11] : memref<1x128xf32, #tpu.memory_space<vmem>>, vector<1x128xf32>
    %17 = vector.broadcast %16 : vector<1x128xf32> to vector<128x128xf32>
    %18 = arith.addf %15, %17 : vector<128x128xf32>
    %cst_12 = arith.constant 0.000000e+00 : f32
    %19 = vector.broadcast %cst_12 : f32 to vector<128x128xf32>
    %20 = arith.subf %19, %18 : vector<128x128xf32>
    %21 = math.exp %20 : vector<128x128xf32>
    %cst_13 = arith.constant 1.000000e+00 : f32
    %22 = vector.broadcast %cst_13 : f32 to vector<128x128xf32>
    %23 = arith.addf %22, %21 : vector<128x128xf32>
    %24 = tpu.reciprocal %23 {approx = true} : vector<128x128xf32> -> vector<128x128xf32>
    %c0_14 = arith.constant 0 : index
    %c0_15 = arith.constant 0 : index
    %25 = vector.load %arg6[%c0_14, %c0_15] : memref<128x128xf32, #tpu.memory_space<vmem>>, vector<128x128xf32>
    tpu.vector_store %arg6[%c0_14, %c0_15], %24 {strides = array<i32>} : memref<128x128xf32, #tpu.memory_space<vmem>>, vector<128x128xf32>,
    return
  }
  func.func @transform_0(%arg0: i32) -> (i32, i32) {
    %c0_i32 = arith.constant 0 : i32
    %c0_i32_0 = arith.constant 0 : i32
    return %arg0, %c0_i32 : i32, i32
  }
  func.func @transform_1(%arg0: i32) -> (i32, i32) {
    %c0_i32 = arith.constant 0 : i32
    %c0_i32_0 = arith.constant 0 : i32
    %c0_i32_1 = arith.constant 0 : i32
    return %c0_i32, %c0_i32_0 : i32, i32
  }
  func.func @transform_2(%arg0: i32) -> (i32, i32) {
    %c0_i32 = arith.constant 0 : i32
    %c0_i32_0 = arith.constant 0 : i32
    %c0_i32_1 = arith.constant 0 : i32
    return %c0_i32, %c0_i32_0 : i32, i32
  }
  func.func @transform_3(%arg0: i32) -> (i32, i32) {
    %c0_i32 = arith.constant 0 : i32
    %c0_i32_0 = arith.constant 0 : i32
    %c0_i32_1 = arith.constant 0 : i32
    return %c0_i32, %c0_i32_0 : i32, i32
  }
  func.func @transform_4(%arg0: i32) -> (i32, i32) {
    %c0_i32 = arith.constant 0 : i32
    %c0_i32_0 = arith.constant 0 : i32
    %c0_i32_1 = arith.constant 0 : i32
    return %c0_i32, %c0_i32_0 : i32, i32
  }
  func.func @transform_5(%arg0: i32) -> (i32, i32) {
    %c0_i32 = arith.constant 0 : i32
    %c0_i32_0 = arith.constant 0 : i32
    return %arg0, %c0_i32 : i32, i32
  }
}

</mosaic_0001>

<bundles_post_ra>
// kernel: tpu_custom_call.1
= control target key start
LH: loop header
LB: loop body
LE: loop exit
PB: predicated region body
PF: predicated region fallthrough
CT: control target
= control target key end

     0   :  { %10 = vsyncpa [#allocation3], 0  ;;  %s1589_s0 = inlined_call_operand.vmem [shape: f32[256,160], index: 0, kind: input, shape index: {}]   ;;  %s1590_s1 = inlined_call_operand.vmem [shape: bf16[32,160], index: 1, kind: input, shape index: {}]   ;;  %s1591_s2 = inlined_call_operand.vmem [shape: f32[1,32], index: 2, kind: input, shape index: {}]   ;;  %s1592_s3 = inlined_call_operand.vmem [shape: bf16[128,32], index: 3, kind: input, shape index: {}]   ;;  %s1593_s4 = inlined_call_operand.vmem [shape: f32[1,128], index: 4, kind: input, shape index: {}]   ;;  %s1594_s5 = inlined_call_operand.hbm [shape: f32[256,128], index: 5, kind: output, shape index: {}]  }
   0x1   :  { %12 = vsyncpa [#allocation3 + $0x1], 0  ;;  %s1310_s18 = smov 0   ;;  %s1312_s19 = smov 0  }
   0x2   :  { %s1314_s20 = smov 0   ;;  %s1316_s21 = smov 0  }
   0x3 LB: > { %s1331_s22 = sadd.s32 4294967295, %s1275_s21   ;;  %s903_s23 = sadd.s32 4294967294, %s1275_s21   ;;  %s1275_s21 = sphi %s1316_s21, %s1600_s21   ;;  %s1271_s20 = sphi %s1314_s20, %s1599_s20   ;;  %s1267_s19 = sphi %s1312_s19, %s1598_s19   ;;  %s1263_s18 = sphi %s1310_s18, %s1597_s18  }
   0x4   : > { %s1335_s24 = sadd.s32 1, %s1275_s21   ;;  %s135_s25 = sadd.s32 1, %s1271_s20 }
   0x5   : > { %s132_s26 = ssub.s32 %s1275_s21, %s1335_s24  ;;  %p145_p0 = scmp.ne.s32.totalorder %s1271_s20, %s1267_s19 }
   0x6   : > { %p133_p1 = scmp.eq.s32.totalorder %s132_s26, 0  ;;  %p146_p2 = scmp.eq.s32.totalorder %s1331_s22, 1 }
   0x7   : > { %p151_p3 = scmp.ne.s32.totalorder %s1267_s19, %s1263_s18  ;;  %p152_p4 = scmp.eq.s32.totalorder %s903_s23, 1 }
   0x8   : > { %s1346_s27 = scalar_select %p133_p1, %s1271_s20, %s135_s25  }
   0x9   : > { %p1348_p5 = por %p146_p2, %p145_p0  ;;  %p1352_p6 = por %p152_p4, %p151_p3 }
   0xa   : > { %p906_p7 = scmp.ge.s32.totalorder %s1275_s21, 1  ;;  %p192_p8 = scmp.lt.s32.totalorder %s1275_s21, 3 }
   0xc   : > { %p193_p9 = pnand %p906_p7, %p192_p8 }
   0xd   : > { %v1071_v0 = vld [vmem:[%s1590_s1 + $0x4] ss:$8 sps:$4 sm:$0xff] (!%p193_p9)   ;;  %vm307_vm0 = vcmask (!%p193_p9), 261120   ;;  %s908_s7 = sshll.u32 (!%p193_p9), %s1331_s22, 4  ;;  %v1073_v1 = vld [vmem:[%s1590_s1] ss:$8 sps:$4 sm:$0xff] (!%p193_p9)  }
   0xe   : > { %196 = sbr.rel (%p193_p9) target bundleno = 595 (0x253), region = 40  ;;  %p222_p10 = scmp.lt.s32.totalorder (!%p193_p9), %s908_s7, 31  ;;  %916 = vmatprep.subr.msk.bf16.mxu0 (!%p193_p9), %vm307_vm0, %v1071_v0  ;;  %v1074_v2 = vld [vmem:[%s1590_s1 + $0x14] ss:$8 sps:$4 sm:$0xff] (!%p193_p9)   ;;  %v1077_v3 = vld [vmem:[%s1592_s3] sm:$0xff] (!%p193_p9)   ;;  %v1078_v5 = vld [vmem:[%s1592_s3 + $0x8] sm:$0xff] (!%p193_p9)  }
   0xf   : > { %339 = vmatpush1.bf16.xpose.msra.mxu0 (!%p193_p9), %v1073_v1  ;;  %v611_v4 = vsel (!%p193_p9), %vm307_vm0, %v1077_v3, 0  ;;  %1015 = vmatprep.subr.msk.bf16.mxu1 (!%p193_p9), %vm307_vm0, %v1077_v3  ;;  %v1076_v6 = vld [vmem:[%s1590_s1 + $0x10] ss:$8 sps:$4 sm:$0xff] (!%p193_p9)   ;;  %v614_v14 = vsel (!%p193_p9), %vm307_vm0, %v1078_v5, 0  ;;  %v1081_v60 = vld [vmem:[%s1592_s3 + $0x20] sm:$0xff] (!%p193_p9)   ;;  %v1082_v62 = vld [vmem:[%s1592_s3 + $0x28] sm:$0xff] (!%p193_p9)  }
  0x10   : > { %917 = vmatprep.subr.msk.bf16.mxu0 (!%p193_p9), %vm307_vm0, %v1074_v2  ;;  %1006 = vmatpush3.bf16.xpose.msra.mxu1 (!%p193_p9), %v611_v4  ;;  %v1079_v15 = vld [vmem:[%s1592_s3 + $0x10] sm:$0xff] (!%p193_p9)   ;;  %v1080_v58 = vld [vmem:[%s1592_s3 + $0x18] sm:$0xff] (!%p193_p9)   ;;  %v623_v61 = vsel (!%p193_p9), %vm307_vm0, %v1081_v60, 0  ;;  %v626_v63 = vsel (!%p193_p9), %vm307_vm0, %v1082_v62, 0  ;;  %s218_s6 = sand.u32 (!%p193_p9), 1, %s1267_s19   ;;  %s949_s9 = sshll.u32 (!%p193_p9), %s1331_s22, 11 }
  0x11   : > { %1017 = vmatprep.subr.msk.bf16.mxu1 (!%p193_p9), %vm307_vm0, %v1078_v5  ;;  %v617_v22 = vsel (!%p193_p9), %vm307_vm0, %v1079_v15, 0  ;;  %v620_v59 = vsel (!%p193_p9), %vm307_vm0, %v1080_v58, 0  ;;  %v1083_v0 = vld [vmem:[%s1592_s3 + $0x30] sm:$0xff] (!%p193_p9)   ;;  %v1084_v2 = vld [vmem:[%s1592_s3 + $0x38] sm:$0xff] (!%p193_p9)   ;;  %s1539_s13 = scalar_lea.hbm (!%p193_p9), %s1594_s5, %s949_s9  ;;  %s1548_s22 = scalar_lea.sflag (!%p193_p9), [#allocation3], %s218_s6 }
  0x12   : > { %v629_v1 = vsel (!%p193_p9), %vm307_vm0, %v1083_v0, 0  ;;  %s1277_s15 = smov (!%p193_p9), [#allocation2]  }
  0x13   : > { %s1217_s16 = sshll.u32 (!%p193_p9), %s1277_s15, 4  ;;  %s1218_s16 = int_to_ptr.vmem [resolvable:$false] %s1217_s16 }
  0x14   : > { %s1219_s17 = scalar_lea.vmem (!%p193_p9), %s1218_s16, 4096 }
  0x15   : > { %s1602_s7 = smov (!%p222_p10, %s908_s7), 31 }
  0x16   : > { %s948_s14 = sshll.u32 %s1602_s7, 4  ;;  %s907_s7 = sshll.u32 %s218_s6, 7 }
  0x17   : > { %s1381_s25 = scalar_lea.vmem %s1589_s0, %s948_s14  ;;  %341 = vmatpush1.bf16.xpose.msra.mxu0 %v1076_v6  ;;  %s1511_s8 = scalar_lea.vmem [#allocation2], %s907_s7 }
  0x18   : > { %v231_v7 = vld [vmem:[%s1381_s25 + $0x8] sm:$0xff]  ;;  %v233_v8 = vld [vmem:[%s1381_s25 + $0x18] sm:$0xff]  ;;  %v230_v10 = vld [vmem:[%s1381_s25] sm:$0xff]  ;;  %1014 = vmatprep.subr.msk.bf16.mxu0 %vm307_vm0, %v1077_v3  ;;  %1007 = vmatpush3.bf16.xpose.msra.mxu1 %v614_v14  ;;  %v632_v3 = vsel %vm307_vm0, %v1084_v2, 0  ;;  %s841_s10 = sshll.u32 %s1511_s8, 4  ;;  %s1541_s10 = int_to_ptr.vmem [resolvable:$true] %s841_s10 }
  0x19   : > { %v263_v9 = vpack.c.bf16 %v233_v8, %v231_v7  ;;  %v232_v11 = vld [vmem:[%s1381_s25 + $0x10] sm:$0xff]  ;;  %v235_v12 = vld [vmem:[%s1381_s25 + $0x28] sm:$0xff]  ;;  %v237_v13 = vld [vmem:[%s1381_s25 + $0x38] sm:$0xff]  ;;  %1019 = vmatprep.subr.msk.bf16.mxu1 %vm307_vm0, %v1079_v15  ;;  %s1213_s14 = scalar_lea.vmem %s1541_s10, 2048  ;;  %p1220_p0 = scmp.lt.s32.totalorder %s1541_s10, %s1218_s16 }
  0x1a   : > { %v262_v16 = vpack.c.bf16 %v232_v11, %v230_v10  ;;  %v265_v17 = vpack.c.bf16 %v237_v13, %v235_v12  ;;  %v234_v18 = vld [vmem:[%s1381_s25 + $0x20] sm:$0xff]  ;;  %v236_v19 = vld [vmem:[%s1381_s25 + $0x30] sm:$0xff]  ;;  %v239_v20 = vld [vmem:[%s1381_s25 + $0x48] sm:$0xff]  ;;  %p1214_p11 = scmp.ne.s32.totalorder %s1541_s10, %s1213_s14  ;;  %p1221_p1 = scmp.lt.s32.totalorder %s1219_s17, %s1213_s14 }
  0x1b   : > { %918 = vmatprep.mubr.msk.bf16.mxu0 %vm307_vm0, %v263_v9  ;;  %v241_v21 = vld [vmem:[%s1381_s25 + $0x58] sm:$0xff]  ;;  %v264_v23 = vpack.c.bf16 %v236_v19, %v234_v18  ;;  %v238_v25 = vld [vmem:[%s1381_s25 + $0x40] sm:$0xff]  ;;  %v240_v26 = vld [vmem:[%s1381_s25 + $0x50] sm:$0xff] }
  0x1c   : > { %v267_v24 = vpack.c.bf16 %v241_v21, %v239_v20  ;;  %v243_v27 = vld [vmem:[%s1381_s25 + $0x68] sm:$0xff]  ;;  %v245_v28 = vld [vmem:[%s1381_s25 + $0x78] sm:$0xff]  ;;  %v266_v29 = vpack.c.bf16 %v240_v26, %v238_v25  ;;  %v242_v31 = vld [vmem:[%s1381_s25 + $0x60] sm:$0xff]  ;;  %p1215_p12 = pnand %p1214_p11, %p1348_p5  ;;  %p1222_p2 = por %p1221_p1, %p1220_p0 }
  0x1d   : > { %v269_v30 = vpack.c.bf16 %v245_v28, %v243_v27  ;;  %v244_v32 = vld [vmem:[%s1381_s25 + $0x70] sm:$0xff]  ;;  %v247_v33 = vld [vmem:[%s1381_s25 + $0x88] sm:$0xff]  ;;  %v249_v34 = vld [vmem:[%s1381_s25 + $0x98] sm:$0xff] }
  0x1e   : > { %371 = vmatmul.mubr.bf16.vlgmr.msra.gmra.mrb[0].mxu0 %v262_v16  ;;  %v268_v35 = vpack.c.bf16 %v244_v32, %v242_v31  ;;  %v271_v36 = vpack.c.bf16 %v249_v34, %v247_v33  ;;  %v246_v37 = vld [vmem:[%s1381_s25 + $0x80] sm:$0xff]  ;;  %v248_v38 = vld [vmem:[%s1381_s25 + $0x90] sm:$0xff]  ;;  %v251_v39 = vld [vmem:[%s1381_s25 + $0xa8] sm:$0xff]  ;;  %p1216_p13 = pneg %p1215_p12 }
  0x1f   : > { %919 = vmatprep.mubr.msk.bf16.mxu0 %vm307_vm0, %v265_v17  ;;  %967 = vmatpush3.bf16.xpose.msra.mxu0 %v611_v4  ;;  %v253_v40 = vld [vmem:[%s1381_s25 + $0xb8] sm:$0xff]  ;;  %v270_v41 = vpack.c.bf16 %v248_v38, %v246_v37  ;;  %v250_v43 = vld [vmem:[%s1381_s25 + $0xa0] sm:$0xff]  ;;  %v252_v44 = vld [vmem:[%s1381_s25 + $0xb0] sm:$0xff] }
  0x20   : > { %1016 = vmatprep.subr.msk.bf16.mxu0 %vm307_vm0, %v1078_v5  ;;  %1008 = vmatpush3.bf16.xpose.msra.mxu1 %v617_v22  ;;  %v273_v42 = vpack.c.bf16 %v253_v40, %v251_v39  ;;  %v255_v45 = vld [vmem:[%s1381_s25 + $0xc8] sm:$0xff]  ;;  %v257_v46 = vld [vmem:[%s1381_s25 + $0xd8] sm:$0xff]  ;;  %v272_v47 = vpack.c.bf16 %v252_v44, %v250_v43  ;;  %v254_v49 = vld [vmem:[%s1381_s25 + $0xc0] sm:$0xff]  ;;  %p1223_p3 = pnand %p1222_p2, %p1216_p13 }
  0x21   : > { %v275_v48 = vpack.c.bf16 %v257_v46, %v255_v45  ;;  %v256_v50 = vld [vmem:[%s1381_s25 + $0xd0] sm:$0xff]  ;;  %v259_v51 = vld [vmem:[%s1381_s25 + $0xe8] sm:$0xff]  ;;  %v261_v52 = vld [vmem:[%s1381_s25 + $0xf8] sm:$0xff]  ;;  %1021 = vmatprep.subr.msk.bf16.mxu1 %vm307_vm0, %v1080_v58 }
  0x22   : > { %v274_v53 = vpack.c.bf16 %v256_v50, %v254_v49  ;;  %v277_v54 = vpack.c.bf16 %v261_v52, %v259_v51  ;;  %v258_v55 = vld [vmem:[%s1381_s25 + $0xe0] sm:$0xff]  ;;  %v260_v56 = vld [vmem:[%s1381_s25 + $0xf0] sm:$0xff] }
  0x23   : > { %v276_v57 = vpack.c.bf16 %v260_v56, %v258_v55  ;;  %v1469_v4 = vld [vmem:[%s1591_s2] ss:$0 sm:$0xff] }
  0x26   : > { %379 = vmatmul.mubr.bf16.gmra.mrb[4].mxu0 %v264_v23 }
  0x27   : > { %920 = vmatprep.mubr.msk.bf16.mxu0 %vm307_vm0, %v267_v24  ;;  %969 = vmatpush3.bf16.xpose.msra.mxu0 %v614_v14 }
  0x28   : > { %1018 = vmatprep.subr.msk.bf16.mxu0 %vm307_vm0, %v1079_v15  ;;  %1009 = vmatpush3.bf16.xpose.msra.mxu1 %v620_v59 }
  0x29   : > { %1023 = vmatprep.subr.msk.bf16.mxu1 %vm307_vm0, %v1081_v60 }
  0x2e   : > { %387 = vmatmul.mubr.bf16.gmra.mrb[8].mxu0 %v266_v29 }
  0x2f   : > { %921 = vmatprep.mubr.msk.bf16.mxu0 %vm307_vm0, %v269_v30  ;;  %971 = vmatpush3.bf16.xpose.msra.mxu0 %v617_v22 }
  0x30   : > { %1020 = vmatprep.subr.msk.bf16.mxu0 %vm307_vm0, %v1080_v58  ;;  %1010 = vmatpush3.bf16.xpose.msra.mxu1 %v623_v61 }
  0x31   : > { %1025 = vmatprep.subr.msk.bf16.mxu1 %vm307_vm0, %v1082_v62 }
  0x36   : > { %395 = vmatmul.mubr.bf16.gmra.mrb[12].mxu0 %v268_v35 }
  0x37   : > { %922 = vmatprep.mubr.msk.bf16.mxu0 %vm307_vm0, %v271_v36  ;;  %973 = vmatpush3.bf16.xpose.msra.mxu0 %v620_v59 }
  0x38   : > { %1022 = vmatprep.subr.msk.bf16.mxu0 %vm307_vm0, %v1081_v60  ;;  %1011 = vmatpush3.bf16.xpose.msra.mxu1 %v626_v63 }
  0x39   : > { %1027 = vmatprep.subr.msk.bf16.mxu1 %vm307_vm0, %v1083_v0 }
  0x3e   : > { %403 = vmatmul.mubr.bf16.gmra.mrb[16].mxu0 %v270_v41 }
  0x3f   : > { %923 = vmatprep.mubr.msk.bf16.mxu0 %vm307_vm0, %v273_v42  ;;  %975 = vmatpush3.bf16.xpose.msra.mxu0 %v623_v61 }
  0x40   : > { %1024 = vmatprep.subr.msk.bf16.mxu0 %vm307_vm0, %v1082_v62  ;;  %1012 = vmatpush3.bf16.xpose.msra.mxu1 %v629_v1 }
  0x41   : > { %1029 = vmatprep.subr.msk.bf16.mxu1 %vm307_vm0, %v1084_v2 }
  0x46   : > { %411 = vmatmul.mubr.bf16.gmra.mrb[20].mxu0 %v272_v47 }
  0x47   : > { %924 = vmatprep.mubr.msk.bf16.mxu0 %vm307_vm0, %v275_v48  ;;  %977 = vmatpush3.bf16.xpose.msra.mxu0 %v626_v63 }
  0x48   : > { %1026 = vmatprep.subr.msk.bf16.mxu0 %vm307_vm0, %v1083_v0  ;;  %1013 = vmatpush3.bf16.xpose.msra.mxu1 %v632_v3 }
  0x4e   : > { %419 = vmatmul.mubr.bf16.gmra.mrb[24].mxu0 %v274_v53 }
  0x4f   : > { %925 = vmatprep.mubr.msk.bf16.mxu0 %vm307_vm0, %v277_v54  ;;  %979 = vmatpush3.bf16.xpose.msra.mxu0 %v629_v1 }
  0x50   : > { %1028 = vmatprep.subr.msk.bf16.mxu0 %vm307_vm0, %v1084_v2 }
  0x56   : > { %427 = vmatmul.mubr.bf16.gmra.mrb[28].mxu0 %v276_v57 }
  0x57   : > { %981 = vmatpush3.bf16.xpose.msra.mxu0 %v632_v3 }
  0xf1   : > { %v372_v5 = vpop.f32.mrb[0].mxu0 }
  0xf2   : > { %v373_v6 = vadd.f32 %v1469_v4, %v372_v5  ;;  %v374_v7 = vpop.f32.mrb[1].mxu0 }
  0xf3   : > { %v375_v8 = vpop.f32.mrb[2].mxu0 }
  0xf4   : > { %v435_v9 = vsub.f32 0.0, %v373_v6  ;;  %v376_v10 = vadd.f32 %v1469_v4, %v375_v8  ;;  %v377_v11 = vpop.f32.mrb[3].mxu0 }
  0xf6   : > { %v451_v12 = vmul.f32 1.442695, %v435_v9  ;;  %v436_v13 = vsub.f32 0.0, %v376_v10 }
  0xf8   : > { %1085 = vpow2.f32 %v451_v12  ;;  %v453_v14 = vmul.f32 1.442695, %v436_v13 }
  0xf9   : > { %v380_v15 = vpop.f32.mrb[4].mxu0 }
  0xfa   : > { %1087 = vpow2.f32 %v453_v14  ;;  %v381_v16 = vadd.f32 %v1469_v4, %v380_v15  ;;  %v382_v17 = vpop.f32.mrb[5].mxu0 }
  0xfb   : > { %v383_v18 = vpop.f32.mrb[6].mxu0 }
  0xfc   : > { %v437_v19 = vsub.f32 0.0, %v381_v16  ;;  %v384_v20 = vadd.f32 %v1469_v4, %v383_v18  ;;  %v385_v21 = vpop.f32.mrb[7].mxu0 }
  0xfe   : > { %v455_v22 = vmul.f32 1.442695, %v437_v19  ;;  %v438_v23 = vsub.f32 0.0, %v384_v20 }
 0x100   : > { %1089 = vpow2.f32 %v455_v22  ;;  %v457_v24 = vmul.f32 1.442695, %v438_v23 }
 0x101   : > { %v388_v25 = vpop.f32.mrb[8].mxu0 }
 0x102   : > { %v1086_v26 = vpop.eup %1085  ;;  %1091 = vpow2.f32 %v457_v24  ;;  %v389_v27 = vadd.f32 %v1469_v4, %v388_v25  ;;  %v390_v28 = vpop.f32.mrb[9].mxu0 }
 0x103   : > { %v483_v29 = vadd.f32 1.0, %v1086_v26  ;;  %v391_v30 = vpop.f32.mrb[10].mxu0 }
 0x104   : > { %v1088_v31 = vpop.eup %1087  ;;  %v439_v32 = vsub.f32 0.0, %v389_v27  ;;  %v392_v33 = vadd.f32 %v1469_v4, %v391_v30  ;;  %v393_v34 = vpop.f32.mrb[11].mxu0 }
 0x105   : > { %v484_v35 = vadd.f32 1.0, %v1088_v31  ;;  %1093 = vrcp.f32 %v483_v29 }
 0x106   : > { %v459_v36 = vmul.f32 1.442695, %v439_v32  ;;  %v440_v37 = vsub.f32 0.0, %v392_v33 }
 0x107   : > { %1095 = vrcp.f32 %v484_v35 }
 0x108   : > { %1097 = vpow2.f32 %v459_v36  ;;  %v461_v38 = vmul.f32 1.442695, %v440_v37 }
 0x109   : > { %v396_v39 = vpop.f32.mrb[12].mxu0 }
 0x10a   : > { %v1090_v40 = vpop.eup %1089  ;;  %1099 = vpow2.f32 %v461_v38  ;;  %v397_v41 = vadd.f32 %v1469_v4, %v396_v39  ;;  %v398_v42 = vpop.f32.mrb[13].mxu0 }
 0x10b   : > { %v485_v43 = vadd.f32 1.0, %v1090_v40  ;;  %v399_v44 = vpop.f32.mrb[14].mxu0 }
 0x10c   : > { %v1092_v45 = vpop.eup %1091  ;;  %v441_v46 = vsub.f32 0.0, %v397_v41  ;;  %v400_v47 = vadd.f32 %v1469_v4, %v399_v44  ;;  %v401_v48 = vpop.f32.mrb[15].mxu0 }
 0x10d   : > { %v486_v49 = vadd.f32 1.0, %v1092_v45  ;;  %1101 = vrcp.f32 %v485_v43 }
 0x10e   : > { %v463_v50 = vmul.f32 1.442695, %v441_v46  ;;  %v442_v51 = vsub.f32 0.0, %v400_v47 }
 0x10f   : > { %1103 = vrcp.f32 %v486_v49  ;;  %v1094_v52 = vpop.eup %1093 }
 0x110   : > { %1105 = vpow2.f32 %v463_v50  ;;  %v465_v53 = vmul.f32 1.442695, %v442_v51 }
 0x111   : > { %v1096_v54 = vpop.eup %1095  ;;  %v404_v55 = vpop.f32.mrb[16].mxu0 }
 0x112   : > { %v1098_v56 = vpop.eup %1097  ;;  %1107 = vpow2.f32 %v465_v53  ;;  %v405_v57 = vadd.f32 %v1469_v4, %v404_v55  ;;  %v406_v58 = vpop.f32.mrb[17].mxu0  ;;  %v515_v59 = vpack.c.bf16 %v1096_v54, %v1094_v52 }
 0x113   : > { %v487_v60 = vadd.f32 1.0, %v1098_v56  ;;  %v407_v61 = vpop.f32.mrb[18].mxu0 }
 0x114   : > { %v1100_v62 = vpop.eup %1099  ;;  %v443_v63 = vsub.f32 0.0, %v405_v57  ;;  %v408_v0 = vadd.f32 %v1469_v4, %v407_v61  ;;  %v409_v1 = vpop.f32.mrb[19].mxu0  ;;  %982 = vmatprep.mubr.msk.bf16.mxu0 %vm307_vm0, %v515_v59 }
 0x115   : > { %v488_v2 = vadd.f32 1.0, %v1100_v62  ;;  %1109 = vrcp.f32 %v487_v60 }
 0x116   : > { %v467_v3 = vmul.f32 1.442695, %v443_v63  ;;  %v444_v5 = vsub.f32 0.0, %v408_v0 }
 0x117   : > { %1111 = vrcp.f32 %v488_v2  ;;  %v1102_v6 = vpop.eup %1101 }
 0x118   : > { %1113 = vpow2.f32 %v467_v3  ;;  %v469_v7 = vmul.f32 1.442695, %v444_v5 }
 0x119   : > { %v1104_v8 = vpop.eup %1103  ;;  %v412_v9 = vpop.f32.mrb[20].mxu0 }
 0x11a   : > { %v1106_v10 = vpop.eup %1105  ;;  %v516_v11 = vpack.c.bf16 %v1104_v8, %v1102_v6  ;;  %1115 = vpow2.f32 %v469_v7  ;;  %v413_v12 = vadd.f32 %v1469_v4, %v412_v9  ;;  %v414_v13 = vpop.f32.mrb[21].mxu0 }
 0x11b   : > { %v489_v14 = vadd.f32 1.0, %v1106_v10  ;;  %v415_v15 = vpop.f32.mrb[22].mxu0 }
 0x11c   : > { %v1108_v16 = vpop.eup %1107  ;;  %v445_v17 = vsub.f32 0.0, %v413_v12  ;;  %v416_v18 = vadd.f32 %v1469_v4, %v415_v15  ;;  %v417_v19 = vpop.f32.mrb[23].mxu0  ;;  %983 = vmatmul.mubr.msk.bf16.vlgmr.msra.gmra.mrb[32].mxu0 %vm307_vm0, %v516_v11 }
 0x11d   : > { %v490_v20 = vadd.f32 1.0, %v1108_v16  ;;  %1117 = vrcp.f32 %v489_v14  ;;  %v1498_v14 = vld [vmem:[%s1593_s4] ss:$0 sm:$0xff] }
 0x11e   : > { %v471_v21 = vmul.f32 1.442695, %v445_v17  ;;  %v446_v22 = vsub.f32 0.0, %v416_v18 }
 0x11f   : > { %1119 = vrcp.f32 %v490_v20  ;;  %v1110_v23 = vpop.eup %1109 }
 0x120   : > { %1121 = vpow2.f32 %v471_v21  ;;  %v473_v24 = vmul.f32 1.442695, %v446_v22 }
 0x121   : > { %v1112_v25 = vpop.eup %1111  ;;  %v420_v26 = vpop.f32.mrb[24].mxu0 }
 0x122   : > { %v1114_v27 = vpop.eup %1113  ;;  %1123 = vpow2.f32 %v473_v24  ;;  %v421_v28 = vadd.f32 %v1469_v4, %v420_v26  ;;  %v422_v29 = vpop.f32.mrb[25].mxu0  ;;  %v517_v30 = vpack.c.bf16 %v1112_v25, %v1110_v23 }
 0x123   : > { %v491_v31 = vadd.f32 1.0, %v1114_v27  ;;  %v423_v32 = vpop.f32.mrb[26].mxu0 }
 0x124   : > { %v1116_v33 = vpop.eup %1115  ;;  %v447_v34 = vsub.f32 0.0, %v421_v28  ;;  %v424_v35 = vadd.f32 %v1469_v4, %v423_v32  ;;  %v425_v36 = vpop.f32.mrb[27].mxu0  ;;  %986 = vmatprep.mubr.msk.bf16.mxu1 %vm307_vm0, %v517_v30 }
 0x125   : > { %v492_v37 = vadd.f32 1.0, %v1116_v33  ;;  %1125 = vrcp.f32 %v491_v31 }
 0x126   : > { %v475_v38 = vmul.f32 1.442695, %v447_v34  ;;  %v448_v39 = vsub.f32 0.0, %v424_v35 }
 0x127   : > { %1127 = vrcp.f32 %v492_v37  ;;  %v1118_v40 = vpop.eup %1117 }
 0x128   : > { %1129 = vpow2.f32 %v475_v38  ;;  %v477_v41 = vmul.f32 1.442695, %v448_v39 }
 0x129   : > { %v1120_v42 = vpop.eup %1119  ;;  %v428_v43 = vpop.f32.mrb[28].mxu0 }
 0x12a   : > { %v1122_v44 = vpop.eup %1121  ;;  %1131 = vpow2.f32 %v477_v41  ;;  %v429_v45 = vadd.f32 %v1469_v4, %v428_v43  ;;  %v430_v46 = vpop.f32.mrb[29].mxu0  ;;  %v518_v47 = vpack.c.bf16 %v1120_v42, %v1118_v40 }
 0x12b   : > { %v493_v48 = vadd.f32 1.0, %v1122_v44  ;;  %v431_v49 = vpop.f32.mrb[30].mxu0 }
 0x12c   : > { %v1124_v50 = vpop.eup %1123  ;;  %v449_v51 = vsub.f32 0.0, %v429_v45  ;;  %v432_v52 = vadd.f32 %v1469_v4, %v431_v49  ;;  %v433_v53 = vpop.f32.mrb[31].mxu0  ;;  %987 = vmatmul.mubr.msk.bf16.vlgmr.msra.gmra.mrb[0].mxu1 %vm307_vm0, %v518_v47 }
 0x12d   : > { %v494_v54 = vadd.f32 1.0, %v1124_v50  ;;  %1133 = vrcp.f32 %v493_v48 }
 0x12e   : > { %v479_v55 = vmul.f32 1.442695, %v449_v51  ;;  %v450_v56 = vsub.f32 0.0, %v432_v52 }
 0x12f   : > { %1135 = vrcp.f32 %v494_v54  ;;  %v1126_v57 = vpop.eup %1125 }
 0x130   : > { %1137 = vpow2.f32 %v479_v55  ;;  %v481_v58 = vmul.f32 1.442695, %v450_v56 }
 0x131   : > { %v1128_v59 = vpop.eup %1127 }
 0x132   : > { %v1130_v60 = vpop.eup %1129  ;;  %1139 = vpow2.f32 %v481_v58  ;;  %v519_v61 = vpack.c.bf16 %v1128_v59, %v1126_v57 }
 0x133   : > { %v495_v62 = vadd.f32 1.0, %v1130_v60 }
 0x134   : > { %v1132_v63 = vpop.eup %1131  ;;  %990 = vmatprep.mubr.msk.bf16.mxu1 %vm307_vm0, %v519_v61 }
 0x135   : > { %v496_v4 = vadd.f32 1.0, %v1132_v63  ;;  %1141 = vrcp.f32 %v495_v62 }
 0x137   : > { %1143 = vrcp.f32 %v496_v4  ;;  %v1134_v0 = vpop.eup %1133 }
 0x139   : > { %v1136_v1 = vpop.eup %1135 }
 0x13a   : > { %v1138_v2 = vpop.eup %1137  ;;  %v520_v3 = vpack.c.bf16 %v1136_v1, %v1134_v0 }
 0x13b   : > { %v497_v5 = vadd.f32 1.0, %v1138_v2 }
 0x13c   : > { %v1140_v6 = vpop.eup %1139  ;;  %991 = vmatmul.mubr.msk.bf16.gmra.mrb[4].mxu1 %vm307_vm0, %v520_v3 }
 0x13d   : > { %v498_v7 = vadd.f32 1.0, %v1140_v6  ;;  %1145 = vrcp.f32 %v497_v5 }
 0x13f   : > { %1147 = vrcp.f32 %v498_v7  ;;  %v1142_v8 = vpop.eup %1141 }
 0x141   : > { %v1144_v9 = vpop.eup %1143 }
 0x142   : > { %v521_v10 = vpack.c.bf16 %v1144_v9, %v1142_v8 }
 0x144   : > { %994 = vmatprep.mubr.msk.bf16.mxu1 %vm307_vm0, %v521_v10 }
 0x147   : > { %v1146_v11 = vpop.eup %1145 }
 0x149   : > { %v1148_v12 = vpop.eup %1147 }
 0x14a   : > { %v522_v13 = vpack.c.bf16 %v1148_v12, %v1146_v11 }
 0x14c   : > { %995 = vmatmul.mubr.msk.bf16.gmra.mrb[8].mxu1 %vm307_vm0, %v522_v13 }
 0x1ef   : > { %v984_v15 = vpop.f32.mrb[32].mxu0 }
 0x1f0   : > { %v677_v16 = vadd.f32 %v984_v15, %v1498_v14  ;;  %v668_v17 = vpop.f32.mrb[33].mxu0 }
 0x1f1   : > { %v669_v18 = vadd.f32 %v1498_v14, %v668_v17  ;;  %v985_v19 = vpop.f32.mrb[34].mxu0 }
 0x1f2   : > { %v733_v20 = vsub.f32 0.0, %v677_v16  ;;  %v680_v21 = vadd.f32 %v985_v19, %v1498_v14  ;;  %v671_v22 = vpop.f32.mrb[35].mxu0 }
 0x1f3   : > { %v731_v23 = vsub.f32 0.0, %v669_v18  ;;  %v672_v24 = vadd.f32 %v1498_v14, %v671_v22 }
 0x1f4   : > { %v751_v25 = vmul.f32 1.442695, %v733_v20  ;;  %v734_v26 = vsub.f32 0.0, %v680_v21 }
 0x1f5   : > { %v747_v27 = vmul.f32 1.442695, %v731_v23  ;;  %v732_v28 = vsub.f32 0.0, %v672_v24 }
 0x1f6   : > { %1149 = vpow2.f32 %v751_v25  ;;  %v753_v29 = vmul.f32 1.442695, %v734_v26 }
 0x1f7   : > { %1151 = vpow2.f32 %v747_v27  ;;  %v749_v30 = vmul.f32 1.442695, %v732_v28 }
 0x1f8   : > { %1153 = vpow2.f32 %v753_v29 }
 0x1f9   : > { %1155 = vpow2.f32 %v749_v30 }
 0x1ff   : > { %v988_v31 = vpop.f32.mrb[0].mxu1 }
 0x200   : > { %v1150_v32 = vpop.eup %1149  ;;  %v693_v33 = vadd.f32 %v988_v31, %v1498_v14  ;;  %v684_v34 = vpop.f32.mrb[1].mxu1 }
 0x201   : > { %v1152_v35 = vpop.eup %1151  ;;  %v781_v36 = vadd.f32 1.0, %v1150_v32  ;;  %v685_v37 = vadd.f32 %v1498_v14, %v684_v34  ;;  %v989_v38 = vpop.f32.mrb[2].mxu1 }
 0x202   : > { %v1154_v39 = vpop.eup %1153  ;;  %v779_v40 = vadd.f32 1.0, %v1152_v35  ;;  %v737_v41 = vsub.f32 0.0, %v693_v33  ;;  %v696_v42 = vadd.f32 %v989_v38, %v1498_v14  ;;  %v687_v43 = vpop.f32.mrb[3].mxu1 }
 0x203   : > { %v1156_v44 = vpop.eup %1155  ;;  %1157 = vrcp.f32 %v781_v36  ;;  %v782_v45 = vadd.f32 1.0, %v1154_v39  ;;  %v735_v46 = vsub.f32 0.0, %v685_v37  ;;  %v688_v47 = vadd.f32 %v1498_v14, %v687_v43 }
 0x204   : > { %1159 = vrcp.f32 %v779_v40  ;;  %v780_v48 = vadd.f32 1.0, %v1156_v44  ;;  %v759_v49 = vmul.f32 1.442695, %v737_v41  ;;  %v738_v50 = vsub.f32 0.0, %v696_v42 }
 0x205   : > { %1161 = vrcp.f32 %v782_v45  ;;  %v755_v51 = vmul.f32 1.442695, %v735_v46  ;;  %v736_v52 = vsub.f32 0.0, %v688_v47 }
 0x206   : > { %1163 = vrcp.f32 %v780_v48  ;;  %v761_v53 = vmul.f32 1.442695, %v738_v50 }
 0x207   : > { %1165 = vpow2.f32 %v759_v49  ;;  %v757_v54 = vmul.f32 1.442695, %v736_v52 }
 0x208   : > { %1167 = vpow2.f32 %v755_v51 }
 0x209   : > { %1169 = vpow2.f32 %v761_v53 }
 0x20a   : > { %1171 = vpow2.f32 %v757_v54 }
 0x20d   : > { %v1158_v55 = vpop.eup %1157 }
 0x20e   : > { %v1160_v56 = vpop.eup %1159  ;;  %813 = vst [vmem:[%s1511_s8 + $0x10] sm:$0xff] %v1158_v55 }
 0x20f   : > { %v1162_v57 = vpop.eup %1161  ;;  %811 = vst [vmem:[%s1511_s8] sm:$0xff] %v1160_v56  ;;  %v992_v58 = vpop.f32.mrb[4].mxu1 }
 0x210   : > { %v1164_v59 = vpop.eup %1163  ;;  %814 = vst [vmem:[%s1511_s8 + $0x18] sm:$0xff] %v1162_v57  ;;  %v709_v60 = vadd.f32 %v992_v58, %v1498_v14  ;;  %v700_v61 = vpop.f32.mrb[5].mxu1 }
 0x211   : > { %v1166_v62 = vpop.eup %1165  ;;  %812 = vst [vmem:[%s1511_s8 + $0x8] sm:$0xff] %v1164_v59  ;;  %v701_v63 = vadd.f32 %v1498_v14, %v700_v61  ;;  %v993_v4 = vpop.f32.mrb[6].mxu1 }
 0x212   : > { %v1168_v0 = vpop.eup %1167  ;;  %v785_v1 = vadd.f32 1.0, %v1166_v62  ;;  %v741_v2 = vsub.f32 0.0, %v709_v60  ;;  %v712_v3 = vadd.f32 %v993_v4, %v1498_v14  ;;  %v703_v5 = vpop.f32.mrb[7].mxu1 }
 0x213   : > { %v1170_v6 = vpop.eup %1169  ;;  %v783_v7 = vadd.f32 1.0, %v1168_v0  ;;  %v739_v8 = vsub.f32 0.0, %v701_v63  ;;  %v704_v9 = vadd.f32 %v1498_v14, %v703_v5 }
 0x214   : > { %v1172_v10 = vpop.eup %1171  ;;  %1173 = vrcp.f32 %v785_v1  ;;  %v786_v11 = vadd.f32 1.0, %v1170_v6  ;;  %v767_v12 = vmul.f32 1.442695, %v741_v2  ;;  %v742_v13 = vsub.f32 0.0, %v712_v3 }
 0x215   : > { %1175 = vrcp.f32 %v783_v7  ;;  %v784_v15 = vadd.f32 1.0, %v1172_v10  ;;  %v763_v16 = vmul.f32 1.442695, %v739_v8  ;;  %v740_v17 = vsub.f32 0.0, %v704_v9 }
 0x216   : > { %1177 = vrcp.f32 %v786_v11  ;;  %v769_v18 = vmul.f32 1.442695, %v742_v13 }
 0x217   : > { %1179 = vrcp.f32 %v784_v15  ;;  %v765_v19 = vmul.f32 1.442695, %v740_v17 }
 0x218   : > { %1181 = vpow2.f32 %v767_v12 }
 0x219   : > { %1183 = vpow2.f32 %v763_v16 }
 0x21a   : > { %1185 = vpow2.f32 %v769_v18 }
 0x21b   : > { %1187 = vpow2.f32 %v765_v19 }
 0x21e   : > { %v1174_v20 = vpop.eup %1173 }
 0x21f   : > { %v1176_v21 = vpop.eup %1175  ;;  %817 = vst [vmem:[%s1511_s8 + $0x30] sm:$0xff] %v1174_v20  ;;  %v996_v22 = vpop.f32.mrb[8].mxu1 }
 0x220   : > { %v1178_v23 = vpop.eup %1177  ;;  %815 = vst [vmem:[%s1511_s8 + $0x20] sm:$0xff] %v1176_v21  ;;  %v725_v24 = vadd.f32 %v996_v22, %v1498_v14  ;;  %v716_v25 = vpop.f32.mrb[9].mxu1 }
 0x221   : > { %v1180_v26 = vpop.eup %1179  ;;  %818 = vst [vmem:[%s1511_s8 + $0x38] sm:$0xff] %v1178_v23  ;;  %v717_v27 = vadd.f32 %v1498_v14, %v716_v25  ;;  %v997_v28 = vpop.f32.mrb[10].mxu1 }
 0x222   : > { %v1182_v29 = vpop.eup %1181  ;;  %816 = vst [vmem:[%s1511_s8 + $0x28] sm:$0xff] %v1180_v26  ;;  %v745_v30 = vsub.f32 0.0, %v725_v24  ;;  %v728_v31 = vadd.f32 %v997_v28, %v1498_v14  ;;  %v719_v32 = vpop.f32.mrb[11].mxu1 }
 0x223   : > { %v1184_v33 = vpop.eup %1183  ;;  %v789_v34 = vadd.f32 1.0, %v1182_v29  ;;  %v743_v35 = vsub.f32 0.0, %v717_v27  ;;  %v720_v36 = vadd.f32 %v1498_v14, %v719_v32 }
 0x224   : > { %v1186_v37 = vpop.eup %1185  ;;  %v787_v38 = vadd.f32 1.0, %v1184_v33  ;;  %v746_v39 = vsub.f32 0.0, %v728_v31  ;;  %v775_v42 = vmul.f32 1.442695, %v745_v30 }
 0x225   : > { %v1188_v40 = vpop.eup %1187  ;;  %1189 = vrcp.f32 %v789_v34  ;;  %v790_v41 = vadd.f32 1.0, %v1186_v37  ;;  %v744_v43 = vsub.f32 0.0, %v720_v36  ;;  %v771_v45 = vmul.f32 1.442695, %v743_v35 }
 0x226   : > { %1191 = vrcp.f32 %v787_v38  ;;  %v788_v44 = vadd.f32 1.0, %v1188_v40  ;;  %v777_v46 = vmul.f32 1.442695, %v746_v39 }
 0x227   : > { %1193 = vrcp.f32 %v790_v41  ;;  %v773_v47 = vmul.f32 1.442695, %v744_v43 }
 0x228   : > { %1195 = vrcp.f32 %v788_v44 }
 0x229   : > { %1197 = vpow2.f32 %v775_v42 }
 0x22a   : > { %1199 = vpow2.f32 %v771_v45 }
 0x22b   : > { %1201 = vpow2.f32 %v777_v46 }
 0x22c   : > { %1203 = vpow2.f32 %v773_v47 }
 0x22f   : > { %v1190_v14 = vpop.eup %1189 }
 0x230   : > { %v1192_v48 = vpop.eup %1191  ;;  %821 = vst [vmem:[%s1511_s8 + $0x50] sm:$0xff] %v1190_v14 }
 0x231   : > { %v1194_v49 = vpop.eup %1193  ;;  %819 = vst [vmem:[%s1511_s8 + $0x40] sm:$0xff] %v1192_v48 }
 0x232   : > { %v1196_v50 = vpop.eup %1195  ;;  %822 = vst [vmem:[%s1511_s8 + $0x58] sm:$0xff] %v1194_v49 }
 0x233   : > { %v1198_v51 = vpop.eup %1197  ;;  %820 = vst [vmem:[%s1511_s8 + $0x48] sm:$0xff] %v1196_v50 }
 0x234   : > { %v1200_v52 = vpop.eup %1199  ;;  %v793_v53 = vadd.f32 1.0, %v1198_v51 }
 0x235   : > { %v1202_v54 = vpop.eup %1201  ;;  %v791_v55 = vadd.f32 1.0, %v1200_v52 }
 0x236   : > { %v1204_v56 = vpop.eup %1203  ;;  %1205 = vrcp.f32 %v793_v53  ;;  %v794_v57 = vadd.f32 1.0, %v1202_v54 }
 0x237   : > { %1207 = vrcp.f32 %v791_v55  ;;  %v792_v58 = vadd.f32 1.0, %v1204_v56 }
 0x238   : > { %1209 = vrcp.f32 %v794_v57 }
 0x239   : > { %1211 = vrcp.f32 %v792_v58 }
 0x240   : > { %v1206_v59 = vpop.eup %1205 }
 0x241   : > { %v1208_v60 = vpop.eup %1207  ;;  %825 = vst [vmem:[%s1511_s8 + $0x70] sm:$0xff] %v1206_v59 }
 0x242   : > { %v1210_v61 = vpop.eup %1209  ;;  %823 = vst [vmem:[%s1511_s8 + $0x60] sm:$0xff] %v1208_v60 }
 0x243   : > { %v1212_v62 = vpop.eup %1211  ;;  %826 = vst [vmem:[%s1511_s8 + $0x78] sm:$0xff] %v1210_v61 }
 0x244   : > { %824 = vst [vmem:[%s1511_s8 + $0x68] sm:$0xff] %v1212_v62 }
 0x245   : > { %1226 = shalt.err (!%p1223_p3)
}
 0x246   : > { %s1227_s23 = scalar_lea.hbm %s1539_s13, 2048  ;;  %s1231_s30 = scalar_lea.hbm %s1594_s5, 4096 }
 0x247   : > { %p1228_p4 = scmp.ne.s32.totalorder %s1539_s13, %s1227_s23  ;;  %p1232_p9 = scmp.lt.u32.totalorder %s1539_s13, %s1594_s5 }
 0x248   : > { %p1233_p10 = scmp.lt.u32.totalorder %s1231_s30, %s1227_s23  ;;  %p1235_p12 = scmp.lt.u32.totalorder %s1227_s23, %s1539_s13 }
 0x249   : > { %p1229_p7 = pnand %p1228_p4, %p1348_p5 }
 0x24a   : > { %p1234_p11 = por %p1233_p10, %p1232_p9 }
 0x24b   : > { %p1230_p8 = pneg %p1229_p7 }
 0x24c   : > { %p1236_p13 = por %p1235_p12, %p1234_p11 }
 0x24e   : > { %p1237_p0 = pnand %p1236_p13, %p1230_p8 }
 0x250   : > { %1240 = shalt.err (!%p1237_p0)
}
 0x251   : > { %s1278_s8 = smov 128   ;;  %s1279_s9 = smov 8  }
 0x252   : > { %1030 = dma.vmem_to_hbm [thread:$0]  (%p1348_p5), %s1541_s10, 2048, %s1539_s13, %s1548_s22, %s1278_s8, %s1278_s8, %s1279_s9  }
 0x253 PF: > { %p1036_p1 = scmp.ge.s32.totalorder %s1275_s21, 2  ;;  %s856_s11 = sand.u32 1, %s1263_s18  }
 0x254   : > { %s857_s12 = scalar_lea.sflag [#allocation3], %s856_s11 }
 0x255   : > { %p1033_p2 = pnand %p1036_p1, %p1352_p6 }
 0x257   : > { %1258 = dma.done.wait (!%p1033_p2), %s857_s12, 2048  }
 0x258   : > { %1260 = vsyncadd (!%p1033_p2), %s857_s12, 4294965248  ;;  %p15_p3 = scmp.ge.s32.totalorder %s1335_s24, 4   ;;  %s1597_s18 = smov %s1267_s19 }
 0x259   : > { %s1598_s19 = smov %s1271_s20  ;;  %s1599_s20 = smov %s1346_s27 }
 0x25a   : > { %s1600_s21 = smov %s1335_s24  ;;  %17 = sbr.rel (!%p15_p3) target bundleno = 3 (0x3), region = 75 }
 0x261   :  { %862 = vsyncpa [#allocation3], 1 }
 0x262   :  { %864 = vsyncpa [#allocation3 + $0x1], 1 }

</bundles_post_ra>
